<compile_context>
chip_gen: v7x
topology: tpu7x:2x2x1
jax: 0.10.0
libtpu: 0.0.40
codegen_flags: <defaults>
</compile_context>

<pallas_src>
import functools

import jax
import jax.numpy as jnp
from jax.experimental import pallas as pl
from jax.experimental.pallas import tpu as pltpu


def _vmem_capacity_bytes():
    try:
        return int(pltpu.get_tpu_info().vmem_capacity_bytes)
    except Exception:
        return 64 * 1024 * 1024  # conservative (v7x-sized) fallback


def _choose_tile_b(batch, d, itemsize):
    # Bytes in flight per (row, feature) element:
    #   3 inputs x 2 pipeline buffers at the streamed itemsize, plus ~3
    #   f32-sized temporaries for the in-kernel upcast / diff / square math.
    bytes_per_row = d * (6 * itemsize + 3 * 4)
    budget = min(_vmem_capacity_bytes() // 2, 40 * 1024 * 1024)
    tb = budget // bytes_per_row
    tb = max(8, (tb // 8) * 8)
    tb = min(tb, 8192)
    if tb >= batch:
        return batch  # single full-extent block; exempt from 8-divisibility
    return tb


def _triplet_loss_kernel(a_ref, p_ref, n_ref, out_ref, *, margin, tile_b, batch):
    # (tile_b, D) tiles; upcast to f32 for the distance math.
    a = a_ref[...].astype(jnp.float32)
    p = p_ref[...].astype(jnp.float32)
    n = n_ref[...].astype(jnp.float32)

    # Per-row L2 distances along the feature axis (dim=1).
    dp = jnp.sqrt(jnp.sum((a - p) ** 2, axis=1, keepdims=True))  # (tile_b, 1)
    dn = jnp.sqrt(jnp.sum((a - n) ** 2, axis=1, keepdims=True))  # (tile_b, 1)

    losses = jnp.maximum(dp - dn + jnp.float32(margin), 0.0)     # (tile_b, 1)

    # Mask rows of the ragged last tile (unspecified implicit-padding data).
    # Must happen before the sum; jnp.where safely discards any NaN/Inf.
    if batch % tile_b != 0:
        row0 = pl.program_id(0) * tile_b
        rows = row0 + jax.lax.broadcasted_iota(jnp.int32, losses.shape, 0)
        losses = jnp.where(rows < batch, losses, 0.0)

    partial = jnp.sum(losses)  # scalar per tile
    # Per-tile partial sum written into a (1, 8, 128) lane/sublane-dense block
    # (replicated); the wrapper reads element [i, 0, 0].
    out_ref[...] = jnp.broadcast_to(partial, out_ref.shape).astype(jnp.float32)


def triplet_loss(anchor, positive, negative, margin, *, tile_b=None,
                 stream_dtype=None):
    """Pallas TPU implementation of TripletLoss.forward (sum reduction).

    stream_dtype: optional opt-in (e.g. jnp.bfloat16) to halve streamed HBM
    bytes. Numerics-changing vs the f32 reference, so default is None.
    """
    assert anchor.shape == positive.shape == negative.shape
    assert anchor.ndim == 2

    if stream_dtype is not None:
        anchor = anchor.astype(stream_dtype)
        positive = positive.astype(stream_dtype)
        negative = negative.astype(stream_dtype)

    B, D = anchor.shape
    itemsize = jnp.dtype(anchor.dtype).itemsize

    if tile_b is None:
        tb = _choose_tile_b(B, D, itemsize)
    else:
        tb = min(int(tile_b), B)
        if tb < B:
            tb = max(8, (tb // 8) * 8)  # sublane divisibility for partial blocks
    num_tiles = pl.cdiv(B, tb)

    # Scoped-VMEM ceiling: one grid step's footprint (inputs + f32 temporaries)
    # with headroom, never above physical-minus-margin (v7x: 64 MiB per TC).
    footprint = tb * D * (6 * itemsize + 3 * 4) + 2 * 8 * 128 * 4
    vmem_cap = _vmem_capacity_bytes()
    vmem_limit = min(max(32 * 1024 * 1024, int(footprint * 1.5)),
                     vmem_cap - 8 * 1024 * 1024)

    kernel = functools.partial(
        _triplet_loss_kernel, margin=float(margin), tile_b=tb, batch=B)

    cost = pl.CostEstimate(
        flops=9 * B * D,
        transcendentals=2 * B,
        bytes_accessed=3 * B * D * itemsize + num_tiles * 8 * 128 * 4)

    partials = pl.pallas_call(
        kernel,
        out_shape=jax.ShapeDtypeStruct((num_tiles, 8, 128), jnp.float32),
        grid=(num_tiles,),
        in_specs=[
            pl.BlockSpec((tb, D), lambda i: (i, 0)),
            pl.BlockSpec((tb, D), lambda i: (i, 0)),
            pl.BlockSpec((tb, D), lambda i: (i, 0)),
        ],
        out_specs=pl.BlockSpec((1, 8, 128), lambda i: (i, 0, 0)),
        compiler_params=pltpu.CompilerParams(
            dimension_semantics=("parallel",),
            vmem_limit_bytes=int(vmem_limit)),
        cost_estimate=cost,
    )(anchor, positive, negative)

    # Tiny final reduction over per-tile partial sums.
    return jnp.sum(partials[:, 0, 0])


def triplet_loss_ref(anchor, positive, negative, margin):
    """Plain-JAX reference (mirrors the PyTorch module, f32 math)."""
    a = anchor.astype(jnp.float32)
    p = positive.astype(jnp.float32)
    n = negative.astype(jnp.float32)
    dp = jnp.sqrt(jnp.sum((a - p) ** 2, axis=1))
    dn = jnp.sqrt(jnp.sum((a - n) ** 2, axis=1))
    return jnp.sum(jnp.maximum(dp - dn + margin, 0.0))


if __name__ == "__main__":
    key = jax.random.PRNGKey(0)
    margin = 1.0
    keys = jax.random.split(key, 6)

    # Case 1: small shapes (B=8, D=32) -> single full-extent tile, no padding.
    a = jax.random.normal(keys[0], (8, 32), dtype=jnp.float32)
    p = jax.random.normal(keys[1], (8, 32), dtype=jnp.float32)
    n = jax.random.normal(keys[2], (8, 32), dtype=jnp.float32)
    out = jax.block_until_ready(triplet_loss(a, p, n, margin))
    ref = triplet_loss_ref(a, p, n, margin)
    assert jnp.allclose(out, ref, rtol=1e-5, atol=1e-4), (out, ref)

    # Case 2: non-(8,128)-aligned shapes with a forced small tile ->
    # multi-tile grid + ragged last-tile mask, still at small sizes.
    a2 = jax.random.normal(keys[3], (50, 200), dtype=jnp.float32)
    p2 = jax.random.normal(keys[4], (50, 200), dtype=jnp.float32)
    n2 = jax.random.normal(keys[5], (50, 200), dtype=jnp.float32)
    out2 = jax.block_until_ready(triplet_loss(a2, p2, n2, margin, tile_b=16))
    ref2 = triplet_loss_ref(a2, p2, n2, margin)
    assert jnp.allclose(out2, ref2, rtol=1e-5, atol=1e-3), (out2, ref2)

    # Case 3: opt-in bf16 streaming path (numerics-changing, gated by flag).
    out3 = jax.block_until_ready(
        triplet_loss(a2, p2, n2, margin, stream_dtype=jnp.bfloat16))
    ref3 = triplet_loss_ref(a2.astype(jnp.bfloat16), p2.astype(jnp.bfloat16),
                            n2.astype(jnp.bfloat16), margin)
    assert jnp.allclose(out3, ref3, rtol=1e-2, atol=1e-1), (out3, ref3)

    print("KERNEL_OK")
</pallas_src>

<mosaic_0001>
module attributes {stable_mosaic.version = 11 : i64} {
  func.func @_triplet_loss_kernel(%arg0: i32, %arg1: memref<8x32xf32, #tpu.memory_space<vmem>>, %arg2: memref<8x32xf32, #tpu.memory_space<vmem>>, %arg3: memref<8x32xf32, #tpu.memory_space<vmem>>, %arg4: memref<1x8x128xf32, #tpu.memory_space<vmem>>) attributes {dimension_semantics = [#tpu.dimension_semantics<parallel>], iteration_bounds = array<i64: 1>, scalar_prefetch = 0 : i64, scratch_operands = 0 : i64, tpu.core_type = #tpu.core_type<tc>, window_params = [{transform_indices = @transform_0, window_bounds = array<i64: 8, 32>}, {transform_indices = @transform_1, window_bounds = array<i64: 8, 32>}, {transform_indices = @transform_2, window_bounds = array<i64: 8, 32>}, {transform_indices = @transform_3, window_bounds = array<i64: 1, 8, 128>}]} {
    %c0 = arith.constant 0 : index
    %c0_0 = arith.constant 0 : index
    %0 = vector.load %arg1[%c0, %c0_0] : memref<8x32xf32, #tpu.memory_space<vmem>>, vector<8x32xf32>
    %c0_1 = arith.constant 0 : index
    %c0_2 = arith.constant 0 : index
    %1 = vector.load %arg2[%c0_1, %c0_2] : memref<8x32xf32, #tpu.memory_space<vmem>>, vector<8x32xf32>
    %c0_3 = arith.constant 0 : index
    %c0_4 = arith.constant 0 : index
    %2 = vector.load %arg3[%c0_3, %c0_4] : memref<8x32xf32, #tpu.memory_space<vmem>>, vector<8x32xf32>
    %3 = arith.subf %0, %1 : vector<8x32xf32>
    %4 = arith.mulf %3, %3 : vector<8x32xf32>
    %cst = arith.constant dense<0.000000e+00> : vector<8xf32>
    %5 = vector.multi_reduction <add>, %4, %cst [1] : vector<8x32xf32> to vector<8xf32>
    %6 = vector.shape_cast %5 : vector<8xf32> to vector<8x1xf32>
    %7 = math.sqrt %6 : vector<8x1xf32>
    %8 = arith.subf %0, %2 : vector<8x32xf32>
    %9 = arith.mulf %8, %8 : vector<8x32xf32>
    %cst_5 = arith.constant dense<0.000000e+00> : vector<8xf32>
    %10 = vector.multi_reduction <add>, %9, %cst_5 [1] : vector<8x32xf32> to vector<8xf32>
    %11 = vector.shape_cast %10 : vector<8xf32> to vector<8x1xf32>
    %12 = math.sqrt %11 : vector<8x1xf32>
    %13 = arith.subf %7, %12 : vector<8x1xf32>
    %cst_6 = arith.constant 1.000000e+00 : f32
    %14 = vector.broadcast %cst_6 : f32 to vector<8x1xf32>
    %15 = arith.addf %13, %14 : vector<8x1xf32>
    %cst_7 = arith.constant 0.000000e+00 : f32
    %16 = vector.broadcast %cst_7 : f32 to vector<8x1xf32>
    %17 = arith.maximumf %15, %16 : vector<8x1xf32>
    %18 = vector.shape_cast %17 : vector<8x1xf32> to vector<1x8x1xf32>
    %cst_8 = arith.constant dense<0.000000e+00> : vector<1xf32>
    %19 = vector.multi_reduction <add>, %18, %cst_8 [1, 2] : vector<1x8x1xf32> to vector<1xf32>
    %20 = vector.shape_cast %19 : vector<1xf32> to vector<1x1x1xf32>
    %21 = vector.extract %20[0, 0, 0] : f32 from vector<1x1x1xf32>
    %22 = vector.broadcast %21 : f32 to vector<1x8x128xf32>
    %c0_9 = arith.constant 0 : index
    %c0_10 = arith.constant 0 : index
    %c0_11 = arith.constant 0 : index
    %23 = vector.load %arg4[%c0_9, %c0_10, %c0_11] : memref<1x8x128xf32, #tpu.memory_space<vmem>>, vector<1x8x128xf32>
    tpu.vector_store %arg4[%c0_9, %c0_10, %c0_11], %22 {strides = array<i32>} : memref<1x8x128xf32, #tpu.memory_space<vmem>>, vector<1x8x128xf32>,
    return
  }
  func.func @transform_0(%arg0: i32) -> (i32, i32) {
    %c0_i32 = arith.constant 0 : i32
    %c0_i32_0 = arith.constant 0 : i32
    return %arg0, %c0_i32 : i32, i32
  }
  func.func @transform_1(%arg0: i32) -> (i32, i32) {
    %c0_i32 = arith.constant 0 : i32
    %c0_i32_0 = arith.constant 0 : i32
    return %arg0, %c0_i32 : i32, i32
  }
  func.func @transform_2(%arg0: i32) -> (i32, i32) {
    %c0_i32 = arith.constant 0 : i32
    %c0_i32_0 = arith.constant 0 : i32
    return %arg0, %c0_i32 : i32, i32
  }
  func.func @transform_3(%arg0: i32) -> (i32, i32, i32) {
    %c0_i32 = arith.constant 0 : i32
    %c0_i32_0 = arith.constant 0 : i32
    %c0_i32_1 = arith.constant 0 : i32
    return %arg0, %c0_i32, %c0_i32_0 : i32, i32, i32
  }
}

</mosaic_0001>

<bundles_post_ra>
// kernel: tpu_custom_call.1
= control target key start
LH: loop header
LB: loop body
LE: loop exit
PB: predicated region body
PF: predicated region fallthrough
CT: control target
= control target key end

     0   :  { %8 = vsyncpa [#allocation3], 0  ;;  %s286_s0 = inlined_call_operand.hbm [shape: f32[8,32], index: 0, kind: input, shape index: {}]   ;;  %s287_s1 = inlined_call_operand.hbm [shape: f32[8,32], index: 1, kind: input, shape index: {}]   ;;  %s288_s2 = inlined_call_operand.hbm [shape: f32[8,32], index: 2, kind: input, shape index: {}]   ;;  %s289_s3 = inlined_call_operand.hbm [shape: f32[1,8,128], index: 3, kind: output, shape index: {}]  }
   0x1   :  { %9 = vsyncpa [#allocation6], 0 }
   0x2   :  { %10 = vsyncpa [#allocation4], 0  ;;  %s214_s12 = smov [#allocation5]   ;;  %s215_s14 = smov [#allocation2]  }
   0x3   :  { %s27_s13 = sshll.u32 %s214_s12, 4  ;;  %s17_s15 = sshll.u32 %s215_s14, 4  ;;  %s28_s13 = int_to_ptr.vmem [resolvable:$true] %s27_s13  ;;  %s18_s15 = int_to_ptr.vmem [resolvable:$true] %s17_s15 }
   0x4   :  { %s120_s18 = scalar_lea.hbm %s287_s1, 128 }
   0x5   :  { %p121_p0 = scmp.ne.s32.totalorder %s287_s1, %s120_s18  ;;  %p124_p1 = scmp.lt.u32.totalorder %s120_s18, %s287_s1 }
   0x7   :  { %p126_p2 = pnand %p124_p1, %p121_p0 }
   0x9   :  { %129 = shalt.err (!%p126_p2)
}
   0xa   :  { %s130_s23 = scalar_lea.vmem %s28_s13, 128  ;;  %p135_p4 = scmp.lt.s32.totalorder %s28_s13, %s28_s13 }
   0xb   :  { %p131_p3 = scmp.ne.s32.totalorder %s28_s13, %s130_s23  ;;  %p136_p5 = scmp.lt.s32.totalorder %s130_s23, %s130_s23 }
   0xd   :  { %p137_p6 = por %p136_p5, %p135_p4 }
   0xf   :  { %p138_p7 = pnand %p137_p6, %p131_p3 }
  0x11   :  { %141 = shalt.err (!%p138_p7)
}
  0x12   :  { %30 = dma.hbm_to_vmem [thread:$0]  %s287_s1, 128, %s28_s13, [#allocation6]  }
  0x13   :  { %s142_s28 = scalar_lea.hbm %s286_s0, 128 }
  0x14   :  { %p143_p8 = scmp.ne.s32.totalorder %s286_s0, %s142_s28  ;;  %p146_p9 = scmp.lt.u32.totalorder %s142_s28, %s286_s0 }
  0x16   :  { %p148_p10 = pnand %p146_p9, %p143_p8 }
  0x18   :  { %151 = shalt.err (!%p148_p10)
}
  0x19   :  { %s152_s6 = scalar_lea.vmem %s18_s15, 128  ;;  %p157_p12 = scmp.lt.s32.totalorder %s18_s15, %s18_s15 }
  0x1a   :  { %p153_p11 = scmp.ne.s32.totalorder %s18_s15, %s152_s6  ;;  %p158_p13 = scmp.lt.s32.totalorder %s152_s6, %s152_s6 }
  0x1c   :  { %p159_p0 = por %p158_p13, %p157_p12 }
  0x1e   :  { %p160_p1 = pnand %p159_p0, %p153_p11 }
  0x20   :  { %163 = shalt.err (!%p160_p1)
}
  0x21   :  { %20 = dma.hbm_to_vmem [thread:$0]  %s286_s0, 128, %s18_s15, [#allocation3]  }
  0x22   :  { %s216_s8 = smov [#allocation7]   ;;  %s164_s12 = scalar_lea.hbm %s288_s2, 128 }
  0x23   :  { %s37_s9 = sshll.u32 %s216_s8, 4  ;;  %p165_p2 = scmp.ne.s32.totalorder %s288_s2, %s164_s12  ;;  %s38_s9 = int_to_ptr.vmem [resolvable:$true] %s37_s9 }
  0x24   :  { %p168_p3 = scmp.lt.u32.totalorder %s164_s12, %s288_s2 }
  0x26   :  { %p170_p4 = pnand %p168_p3, %p165_p2 }
  0x28   :  { %173 = shalt.err (!%p170_p4)
}
  0x29   :  { %s174_s18 = scalar_lea.vmem %s38_s9, 128  ;;  %p179_p6 = scmp.lt.s32.totalorder %s38_s9, %s38_s9 }
  0x2a   :  { %p175_p5 = scmp.ne.s32.totalorder %s38_s9, %s174_s18  ;;  %p180_p7 = scmp.lt.s32.totalorder %s174_s18, %s174_s18 }
  0x2c   :  { %p181_p8 = por %p180_p7, %p179_p6 }
  0x2e   :  { %p182_p9 = pnand %p181_p8, %p175_p5 }
  0x30   :  { %185 = shalt.err (!%p182_p9)
}
  0x31   :  { %40 = dma.hbm_to_vmem [thread:$0]  %s288_s2, 128, %s38_s9, [#allocation6]  }
  0x32   :  { %208 = dma.done.wait [#allocation3], 128  }
  0x33   :  { %209 = vsyncadd [#allocation3], 4294967168 }
  0x34   :  { %210 = dma.done.wait [#allocation6], 256  }
  0x35   :  { %211 = vsyncadd [#allocation6], 4294967040  ;;  %v50_v0 = vld [vmem:[#allocation2] sm:$0xff]  ;;  %v51_v1 = vld [vmem:[#allocation5] sm:$0xff]  ;;  %vm55_vm0 = vcmask 261120   ;;  %vm81_vm5 = vcmask 7168  }
  0x36   :  { %v52_v2 = vld [vmem:[#allocation7] sm:$0xff]  ;;  %v53_v3 = vsub.f32 %v50_v0, %v51_v1  ;;  %s217_s2 = smov [#allocation8]  }
  0x37   :  { %v66_v4 = vsub.f32 %v50_v0, %v52_v2  ;;  %s100_s19 = sshll.u32 %s217_s2, 4  ;;  %s101_s19 = int_to_ptr.vmem [resolvable:$true] %s100_s19 }
  0x38   :  { %v54_v5 = vmul.f32 %v53_v3, %v53_v3  ;;  %s186_s21 = scalar_lea.vmem %s101_s19, 128  ;;  %p191_p11 = scmp.lt.s32.totalorder %s101_s19, %s101_s19 }
  0x39   :  { %v67_v6 = vmul.f32 %v66_v4, %v66_v4  ;;  %p187_p10 = scmp.ne.s32.totalorder %s101_s19, %s186_s21  ;;  %p192_p12 = scmp.lt.s32.totalorder %s186_s21, %s186_s21 }
  0x3a   :  { %v56_v7 = vsel %vm55_vm0, %v54_v5, 0.0 }
  0x3b   :  { %57 = vadd.xlane.f32.xlu0 %v56_v7  ;;  %v68_v8 = vsel %vm55_vm0, %v67_v6, 0.0  ;;  %p193_p13 = por %p192_p12, %p191_p11 }
  0x3d   :  { %p194_p0 = pnand %p193_p13, %p187_p10 }
  0x3f   :  { %69 = vadd.xlane.f32.xlu0 %v68_v8 }
  0xc8   :  { %v58_v9 = vpop.xlane.xlu0 %57 }
  0xc9   :  { %116 = vrsqrt.f32 %v58_v9  ;;  %vm61_vm1 = vcmp.eq.f32.partialorder %v58_v9, inf  ;;  %v64_v16 = vand.u32 2147483648, %v58_v9  ;;  %vm63_vm3 = vcmp.eq.f32.partialorder %v58_v9, 0.0 }
  0xcc   :  { %v70_v10 = vpop.xlane.xlu0 %69 }
  0xcd   :  { %118 = vrsqrt.f32 %v70_v10  ;;  %vm73_vm2 = vcmp.eq.f32.partialorder %v70_v10, inf  ;;  %v76_v17 = vand.u32 2147483648, %v70_v10  ;;  %vm75_vm4 = vcmp.eq.f32.partialorder %v70_v10, 0.0 }
  0xd3   :  { %v117_v11 = vpop.eup %116 }
  0xd4   :  { %v60_v12 = vmul.f32 %v117_v11, %v58_v9 }
  0xd6   :  { %v62_v15 = vsel %vm61_vm1, %v58_v9, %v60_v12 }
  0xd7   :  { %v119_v13 = vpop.eup %118  ;;  %v65_v19 = vsel %vm63_vm3, %v64_v16, %v62_v15 }
  0xd8   :  { %v72_v14 = vmul.f32 %v119_v13, %v70_v10 }
  0xda   :  { %v74_v18 = vsel %vm73_vm2, %v70_v10, %v72_v14 }
  0xdb   :  { %v77_v20 = vsel %vm75_vm4, %v76_v17, %v74_v18 }
  0xdc   :  { %v78_v21 = vsub.f32 %v65_v19, %v77_v20 }
  0xde   :  { %v79_v22 = vadd.f32 1.0, %v78_v21 }
  0xe0   :  { %v80_v23 = vmax.f32 %v79_v22, 0.0 }
  0xe2   :  { %v82_v24 = vsel %vm81_vm5, %v80_v23, 0.0 }
  0xe3   :  { %83 = vadd.xlane.f32.xlu1 %v82_v24 }
 0x170   :  { %v84_v25 = vpop.xlane.xlu1 %83 }
 0x171   :  { %v85_v26 = vrot.slane %v84_v25, 4 }
 0x173   :  { %v86_v27 = vadd.f32 %v85_v26, %v84_v25 }
 0x175   :  { %v87_v28 = vrot.slane %v86_v27, 2 }
 0x177   :  { %v88_v29 = vadd.f32 %v87_v28, %v86_v27 }
 0x179   :  { %v89_v30 = vrot.slane %v88_v29, 1 }
 0x17b   :  { %v90_v31 = vadd.f32 %v89_v30, %v88_v29 }
 0x17d   :  { %110 = vpush %v90_v31 }
 0x1ae   :  { %s111_s20 = spop %110 }
 0x1af   :  { %v92_v32 = vstv %s111_s20 }
 0x1b0   :  { %93 = vst [vmem:[#allocation8] sm:$0xff] %v92_v32 }
 0x1b1   :  { %197 = shalt.err (!%p194_p0)
}
 0x1b2   :  { %s198_s24 = scalar_lea.hbm %s289_s3, 128 }
 0x1b3   :  { %p199_p1 = scmp.ne.s32.totalorder %s289_s3, %s198_s24  ;;  %p202_p2 = scmp.lt.u32.totalorder %s198_s24, %s289_s3 }
 0x1b5   :  { %p204_p3 = pnand %p202_p2, %p199_p1 }
 0x1b7   :  { %207 = shalt.err (!%p204_p3)
}
 0x1b8   :  { %103 = dma.vmem_to_hbm [thread:$0]  %s101_s19, 128, %s289_s3, [#allocation4]  }
 0x1b9   :  { %212 = dma.done.wait [#allocation4], 128  }
 0x1ba   :  { %213 = vsyncadd [#allocation4], 4294967168 }
 0x1bb   :  { %107 = vsyncpa [#allocation3], 1 }
 0x1bc   :  { %108 = vsyncpa [#allocation6], 1 }
 0x1bd   :  { %109 = vsyncpa [#allocation4], 1 }

</bundles_post_ra>
